<compile_context>
chip_gen: v7x
topology: tpu7x:2x2x1
jax: 0.10.0
libtpu: 0.0.40
codegen_flags: <defaults>
</compile_context>

<pallas_src>
import jax
import jax.numpy as jnp
from jax.experimental import pallas as pl
from jax.experimental.pallas import tpu as pltpu


# ---------------------------------------------------------------------------
# Kernel
# ---------------------------------------------------------------------------
def _split_kernel(x_ref, s0_ref, s1_ref, s2_ref):
    # x_ref:  (bn, 3*HW) lane-dense block of the collapsed input.
    # s*_ref: (bn, HW)   per-channel output blocks.
    # HW is a multiple of 128, so every channel slice starts on a vreg lane
    # boundary -> whole-vreg loads/stores, no shuffle work, no spills.
    hw = s0_ref.shape[-1]
    s0_ref[...] = x_ref[:, 0 * hw:1 * hw]
    s1_ref[...] = x_ref[:, 1 * hw:2 * hw]
    s2_ref[...] = x_ref[:, 2 * hw:3 * hw]


# ---------------------------------------------------------------------------
# Tiling heuristics
# ---------------------------------------------------------------------------
_VMEM_BUDGET_BYTES = 24 * 1024 * 1024   # safe on v5e/v6e/v7x scoped VMEM
_SMALL_INPUT_BYTES = 1 * 1024 * 1024    # below this, skip Pallas entirely


def _choose_bn(N, HW, itemsize):
    """Batch-tile size from a VMEM byte budget. Returns 0 if no legal tile."""
    # Per batch row, per grid step: input row (3*HW) + 3 output rows (3*HW),
    # each double-buffered by the BlockSpec pipeline.
    per_row_bytes = 2 * 2 * 3 * HW * itemsize
    bn = max(_VMEM_BUDGET_BYTES // per_row_bytes, 0)
    if N >= 32:
        # Keep >= ~4 grid steps so the pipeline overlaps DMA with compute and
        # dimension_semantics=('parallel',) shards across both TCs on v7x.
        bn = min(bn, -(-N // 4))
    if bn >= N:
        return N                          # full-dim block: always legal
    return (bn // 8) * 8                  # multiple of 8 sublanes (may be 0)


# ---------------------------------------------------------------------------
# Forward wrapper
# ---------------------------------------------------------------------------
def model_forward(v1, *, force_pallas=False):
    N, C, H, W = v1.shape
    assert C == 3, "torch.split(v1, [1,1,1], dim=1) requires dim 1 of size 3"
    HW = H * W
    itemsize = jnp.dtype(v1.dtype).itemsize
    total_bytes = N * 3 * HW * itemsize

    # split([1,1,1], dim=1) followed by cat(dim=1) reconstructs the input
    # exactly, so the concatenated tensor IS v1 (bitwise).  Never re-write it.
    concatenated = v1

    bn = _choose_bn(N, HW, itemsize)
    use_pallas = (HW % 128 == 0) and (bn > 0) and (
        force_pallas or total_bytes >= _SMALL_INPUT_BYTES
    )

    if not use_pallas:
        # Tiny input (or awkward HW): XLA slices are already at roofline.
        splits = (v1[:, 0:1], v1[:, 1:2], v1[:, 2:3])
        return concatenated, splits

    # Free contiguous reshape: collapse channel + spatial dims into lanes.
    x2d = v1.reshape(N, 3 * HW)

    grid = (pl.cdiv(N, bn),)
    out_shape = tuple(jax.ShapeDtypeStruct((N, HW), v1.dtype) for _ in range(3))

    s0, s1, s2 = pl.pallas_call(
        _split_kernel,
        out_shape=out_shape,
        grid=grid,
        in_specs=[pl.BlockSpec((bn, 3 * HW), lambda i: (i, 0))],
        out_specs=tuple(
            pl.BlockSpec((bn, HW), lambda i: (i, 0)) for _ in range(3)
        ),
        compiler_params=pltpu.CompilerParams(
            dimension_semantics=("parallel",),
            vmem_limit_bytes=32 * 1024 * 1024,
        ),
    )(x2d)

    splits = tuple(s.reshape(N, 1, H, W) for s in (s0, s1, s2))
    return concatenated, splits


# ---------------------------------------------------------------------------
# Self-test
# ---------------------------------------------------------------------------
def _check(v1, *, force_pallas):
    cat, splits = model_forward(v1, force_pallas=force_pallas)
    jax.block_until_ready((cat, splits))
    ref_splits = (v1[:, 0:1], v1[:, 1:2], v1[:, 2:3])
    ref_cat = jnp.concatenate(ref_splits, axis=1)
    assert jnp.array_equal(cat, ref_cat)
    for got, ref in zip(splits, ref_splits):
        assert got.shape == ref.shape
        assert jnp.array_equal(got, ref)


if __name__ == "__main__":
    key = jax.random.PRNGKey(0)
    k1, k2 = jax.random.split(key)

    # Small input, same shape family as the spec (dim=1 must be 3):
    # exercises the tiny-input fast path and the forced Pallas path.
    v_small = jax.random.normal(k1, (2, 3, 16, 16), jnp.float32)
    _check(v_small, force_pallas=False)   # fast path (pure JAX slices)
    _check(v_small, force_pallas=True)    # Pallas kernel, grid=(1,)

    # Slightly larger batch so the Pallas kernel runs a multi-step,
    # double-buffered "parallel" grid.
    v_med = jax.random.normal(k2, (64, 3, 32, 32), jnp.float32)
    _check(v_med, force_pallas=True)      # Pallas kernel, grid=(4,)

    print("KERNEL_OK")
</pallas_src>

<mosaic_0001>
module attributes {stable_mosaic.version = 11 : i64} {
  func.func @_split_kernel(%arg0: i32, %arg1: memref<2x768xf32, #tpu.memory_space<vmem>>, %arg2: memref<2x256xf32, #tpu.memory_space<vmem>>, %arg3: memref<2x256xf32, #tpu.memory_space<vmem>>, %arg4: memref<2x256xf32, #tpu.memory_space<vmem>>) attributes {dimension_semantics = [#tpu.dimension_semantics<parallel>], iteration_bounds = array<i64: 1>, scalar_prefetch = 0 : i64, scratch_operands = 0 : i64, tpu.core_type = #tpu.core_type<tc>, window_params = [{transform_indices = @transform_0, window_bounds = array<i64: 2, 768>}, {transform_indices = @transform_1, window_bounds = array<i64: 2, 256>}, {transform_indices = @transform_2, window_bounds = array<i64: 2, 256>}, {transform_indices = @transform_3, window_bounds = array<i64: 2, 256>}]} {
    %c0 = arith.constant 0 : index
    %c0_0 = arith.constant 0 : index
    %0 = vector.load %arg1[%c0, %c0_0] : memref<2x768xf32, #tpu.memory_space<vmem>>, vector<2x256xf32>
    %c0_1 = arith.constant 0 : index
    %c0_2 = arith.constant 0 : index
    %1 = vector.load %arg2[%c0_1, %c0_2] : memref<2x256xf32, #tpu.memory_space<vmem>>, vector<2x256xf32>
    tpu.vector_store %arg2[%c0_1, %c0_2], %0 {strides = array<i32>} : memref<2x256xf32, #tpu.memory_space<vmem>>, vector<2x256xf32>,
    %c0_3 = arith.constant 0 : index
    %c256 = arith.constant 256 : index
    %2 = vector.load %arg1[%c0_3, %c256] : memref<2x768xf32, #tpu.memory_space<vmem>>, vector<2x256xf32>
    %c0_4 = arith.constant 0 : index
    %c0_5 = arith.constant 0 : index
    %3 = vector.load %arg3[%c0_4, %c0_5] : memref<2x256xf32, #tpu.memory_space<vmem>>, vector<2x256xf32>
    tpu.vector_store %arg3[%c0_4, %c0_5], %2 {strides = array<i32>} : memref<2x256xf32, #tpu.memory_space<vmem>>, vector<2x256xf32>,
    %c0_6 = arith.constant 0 : index
    %c512 = arith.constant 512 : index
    %4 = vector.load %arg1[%c0_6, %c512] : memref<2x768xf32, #tpu.memory_space<vmem>>, vector<2x256xf32>
    %c0_7 = arith.constant 0 : index
    %c0_8 = arith.constant 0 : index
    %5 = vector.load %arg4[%c0_7, %c0_8] : memref<2x256xf32, #tpu.memory_space<vmem>>, vector<2x256xf32>
    tpu.vector_store %arg4[%c0_7, %c0_8], %4 {strides = array<i32>} : memref<2x256xf32, #tpu.memory_space<vmem>>, vector<2x256xf32>,
    return
  }
  func.func @transform_0(%arg0: i32) -> (i32, i32) {
    %c0_i32 = arith.constant 0 : i32
    %c0_i32_0 = arith.constant 0 : i32
    return %arg0, %c0_i32 : i32, i32
  }
  func.func @transform_1(%arg0: i32) -> (i32, i32) {
    %c0_i32 = arith.constant 0 : i32
    %c0_i32_0 = arith.constant 0 : i32
    return %arg0, %c0_i32 : i32, i32
  }
  func.func @transform_2(%arg0: i32) -> (i32, i32) {
    %c0_i32 = arith.constant 0 : i32
    %c0_i32_0 = arith.constant 0 : i32
    return %arg0, %c0_i32 : i32, i32
  }
  func.func @transform_3(%arg0: i32) -> (i32, i32) {
    %c0_i32 = arith.constant 0 : i32
    %c0_i32_0 = arith.constant 0 : i32
    return %arg0, %c0_i32 : i32, i32
  }
}

</mosaic_0001>

<bundles_post_ra>
// kernel: tpu_custom_call.1
= control target key start
LH: loop header
LB: loop body
LE: loop exit
PB: predicated region body
PF: predicated region fallthrough
CT: control target
= control target key end

     0   :  { %9 = vsyncpa [#allocation3], 0  ;;  %s257_s0 = inlined_call_operand.hbm [shape: f32[2,768], index: 0, kind: input, shape index: {}]   ;;  %s258_s1 = inlined_call_operand.hbm [shape: f32[2,256], index: 1, kind: output, shape index: {0}]   ;;  %s259_s2 = inlined_call_operand.hbm [shape: f32[2,256], index: 2, kind: output, shape index: {1}]   ;;  %s260_s3 = inlined_call_operand.hbm [shape: f32[2,256], index: 3, kind: output, shape index: {2}]  }
   0x1   :  { %10 = vsyncpa [#allocation4], 0 }
   0x2   :  { %11 = vsyncpa [#allocation7], 0  ;;  %s171_s12 = smov [#allocation2]   ;;  %s77_s16 = scalar_lea.hbm %s257_s0, 192 }
   0x3   :  { %s18_s13 = sshll.u32 %s171_s12, 4  ;;  %p78_p0 = scmp.ne.s32.totalorder %s257_s0, %s77_s16  ;;  %s19_s13 = int_to_ptr.vmem [resolvable:$true] %s18_s13 }
   0x4   :  { %p81_p1 = scmp.lt.u32.totalorder %s77_s16, %s257_s0 }
   0x6   :  { %p83_p2 = pnand %p81_p1, %p78_p0 }
   0x8   :  { %86 = shalt.err (!%p83_p2)
}
   0x9   :  { %s87_s21 = scalar_lea.vmem %s19_s13, 192  ;;  %p92_p4 = scmp.lt.s32.totalorder %s19_s13, %s19_s13 }
   0xa   :  { %p88_p3 = scmp.ne.s32.totalorder %s19_s13, %s87_s21  ;;  %p93_p5 = scmp.lt.s32.totalorder %s87_s21, %s87_s21 }
   0xc   :  { %p94_p6 = por %p93_p5, %p92_p4 }
   0xe   :  { %p95_p7 = pnand %p94_p6, %p88_p3 }
  0x10   :  { %98 = shalt.err (!%p95_p7)
}
  0x11   :  { %21 = dma.hbm_to_vmem [thread:$0]  %s257_s0, 192, %s19_s13, [#allocation3]  }
  0x12   :  { %165 = dma.done.wait [#allocation3], 192  }
  0x13   :  { %166 = vsyncadd [#allocation3], 4294967104  ;;  %s172_s24 = smov [#allocation6]   ;;  %s173_s26 = smov [#allocation5]   ;;  %v27_v0 = vld [vmem:[#allocation2 + $0x4] sm:$0xf] }
  0x14   :  { %s47_s25 = sshll.u32 %s172_s24, 4  ;;  %s37_s27 = sshll.u32 %s173_s26, 4  ;;  %v25_v1 = vld [vmem:[#allocation2] sm:$0xf]  ;;  %v29_v2 = vld [vmem:[#allocation2 + $0x8] sm:$0xf]  ;;  %s48_s25 = int_to_ptr.vmem [resolvable:$true] %s47_s25  ;;  %s207_s27 = int_to_ptr.vmem [resolvable:$true] %s37_s27 }
  0x15   :  { %s174_s28 = smov [#allocation8]   ;;  %28 = vst [vmem:[#allocation6] sm:$0xf] %v27_v0  ;;  %26 = vst [vmem:[#allocation5] sm:$0xf] %v25_v1  ;;  %s99_s0 = scalar_lea.vmem %s48_s25, 64 }
  0x16   :  { %s57_s29 = sshll.u32 %s174_s28, 4  ;;  %30 = vst [vmem:[#allocation8] sm:$0xf] %v29_v2  ;;  %p100_p8 = scmp.ne.s32.totalorder %s48_s25, %s99_s0  ;;  %s209_s29 = int_to_ptr.vmem [resolvable:$true] %s57_s29 }
  0x17   :  { %p104_p9 = scmp.lt.s32.totalorder %s48_s25, %s48_s25  ;;  %p105_p10 = scmp.lt.s32.totalorder %s99_s0, %s99_s0 }
  0x19   :  { %p106_p11 = por %p105_p10, %p104_p9 }
  0x1b   :  { %p107_p12 = pnand %p106_p11, %p100_p8 }
  0x1d   :  { %110 = shalt.err (!%p107_p12)
}
  0x1e   :  { %s111_s5 = scalar_lea.hbm %s259_s2, 64 }
  0x1f   :  { %p112_p13 = scmp.ne.s32.totalorder %s259_s2, %s111_s5  ;;  %p115_p0 = scmp.lt.u32.totalorder %s111_s5, %s259_s2 }
  0x21   :  { %p117_p1 = pnand %p115_p0, %p112_p13 }
  0x23   :  { %120 = shalt.err (!%p117_p1)
}
  0x24   :  { %50 = dma.vmem_to_hbm [thread:$0]  %s48_s25, 64, %s259_s2, [#allocation7]  }
  0x25   :  { %s121_s12 = scalar_lea.vmem %s207_s27, 64  ;;  %p126_p3 = scmp.lt.s32.totalorder %s207_s27, %s207_s27 }
  0x26   :  { %p122_p2 = scmp.ne.s32.totalorder %s207_s27, %s121_s12  ;;  %p127_p4 = scmp.lt.s32.totalorder %s121_s12, %s121_s12 }
  0x28   :  { %p128_p5 = por %p127_p4, %p126_p3 }
  0x2a   :  { %p129_p6 = pnand %p128_p5, %p122_p2 }
  0x2c   :  { %132 = shalt.err (!%p129_p6)
}
  0x2d   :  { %s133_s15 = scalar_lea.hbm %s258_s1, 64 }
  0x2e   :  { %p134_p7 = scmp.ne.s32.totalorder %s258_s1, %s133_s15  ;;  %p137_p8 = scmp.lt.u32.totalorder %s133_s15, %s258_s1 }
  0x30   :  { %p139_p9 = pnand %p137_p8, %p134_p7 }
  0x32   :  { %142 = shalt.err (!%p139_p9)
}
  0x33   :  { %40 = dma.vmem_to_hbm [thread:$0]  %s207_s27, 64, %s258_s1, [#allocation4]  }
  0x34   :  { %s143_s21 = scalar_lea.vmem %s209_s29, 64  ;;  %p148_p11 = scmp.lt.s32.totalorder %s209_s29, %s209_s29 }
  0x35   :  { %p144_p10 = scmp.ne.s32.totalorder %s209_s29, %s143_s21  ;;  %p149_p12 = scmp.lt.s32.totalorder %s143_s21, %s143_s21 }
  0x37   :  { %p150_p13 = por %p149_p12, %p148_p11 }
  0x39   :  { %p151_p0 = pnand %p150_p13, %p144_p10 }
  0x3b   :  { %154 = shalt.err (!%p151_p0)
}
  0x3c   :  { %s155_s24 = scalar_lea.hbm %s260_s3, 64 }
  0x3d   :  { %p156_p1 = scmp.ne.s32.totalorder %s260_s3, %s155_s24  ;;  %p159_p2 = scmp.lt.u32.totalorder %s155_s24, %s260_s3 }
  0x3f   :  { %p161_p3 = pnand %p159_p2, %p156_p1 }
  0x41   :  { %164 = shalt.err (!%p161_p3)
}
  0x42   :  { %60 = dma.vmem_to_hbm [thread:$0]  %s209_s29, 64, %s260_s3, [#allocation7]  }
  0x43   :  { %167 = dma.done.wait [#allocation4], 64  }
  0x44   :  { %168 = vsyncadd [#allocation4], 4294967232 }
  0x45   :  { %169 = dma.done.wait [#allocation7], 128  }
  0x46   :  { %170 = vsyncadd [#allocation7], 4294967168 }
  0x47   :  { %70 = vsyncpa [#allocation3], 1 }
  0x48   :  { %71 = vsyncpa [#allocation4], 1 }
  0x49   :  { %72 = vsyncpa [#allocation7], 1 }

</bundles_post_ra>
